<compile_context>
chip_gen: v7x
topology: tpu7x:2x2x1
jax: 0.10.0
libtpu: 0.0.40
codegen_flags: <defaults>
</compile_context>

<pallas_src>
import jax
import jax.numpy as jnp
import numpy as np
from jax.experimental import pallas as pl
from jax.experimental.pallas import tpu as pltpu

H = 100     # hidden size of the PyTorch module
HP = 128    # sublane-padded hidden size (multiple of 8, one full lane block)

# Columns inside the packed (HP, 4) constants block.
_COL_W1, _COL_W2, _COL_B12, _COL_V = range(4)


def _round_up(n, m):
    return ((n + m - 1) // m) * m


def _cdiv(a, b):
    return -(-a // b)


def mine_kernel(xy_ref, c_ref, out_ref):
    """out[0, b] = sum_h relu(x[b]*w1[h] + y[b]*w2[h] + b12[h]) * v[h].

    Batch on lanes, hidden on sublanes.  The folded fc5 bias rides in the
    padded hidden row H (b12[H]=1, v[H]=c), so no extra scalar add is needed.
    """
    x = xy_ref[0:1, :]                      # (1, TB)   batch on lanes
    y = xy_ref[1:2, :]                      # (1, TB)

    w1  = c_ref[:, _COL_W1:_COL_W1 + 1]     # (HP, 1)   hidden on sublanes
    w2  = c_ref[:, _COL_W2:_COL_W2 + 1]
    b12 = c_ref[:, _COL_B12:_COL_B12 + 1]   # b1 + b2 (+ bias-unit row)
    v   = c_ref[:, _COL_V:_COL_V + 1]       # folded w3@w4@w5 (+ c in row H)

    h1 = jnp.maximum(x * w1 + y * w2 + b12, 0.0)            # (HP, TB)  VPU
    out_ref[...] = jnp.sum(h1 * v, axis=0, keepdims=True)   # (1, TB)   XLU


def _choose_tile(B, tb_max=1024):
    """Lane-aligned batch tile; >=2 grid steps when possible (v7x megacore)."""
    b_lane = _round_up(B, 128)
    if b_lane <= 128:
        return 128, 128
    tiles = max(2, _cdiv(b_lane, tb_max))
    tb = _round_up(_cdiv(b_lane, tiles), 128)
    return tb, tb * tiles


def mine_forward(x, y, const, *, tb_max=1024):
    """Lane-dense, batch-tiled Pallas forward of the folded Mine network."""
    B = x.shape[0]
    tb, b_pad = _choose_tile(B, tb_max)

    # Pack x and y batch-on-lanes into one (2, B_pad) slab.  Zero-padded batch
    # lanes produce garbage (relu(b12)*v) that is simply sliced off below.
    xy = jnp.zeros((2, b_pad), jnp.float32)
    xy = xy.at[0, :B].set(x[:, 0])
    xy = xy.at[1, :B].set(y[:, 0])

    out = pl.pallas_call(
        mine_kernel,
        out_shape=jax.ShapeDtypeStruct((1, b_pad), jnp.float32),
        grid=(b_pad // tb,),
        in_specs=[
            pl.BlockSpec((2, tb), lambda i: (0, i)),    # packed x/y tile
            pl.BlockSpec((HP, 4), lambda i: (0, 0)),    # constants (resident)
        ],
        out_specs=pl.BlockSpec((1, tb), lambda i: (0, i)),  # lane-dense output
        compiler_params=pltpu.CompilerParams(
            dimension_semantics=("parallel",),          # megacore on v7x
        ),
        cost_estimate=pl.CostEstimate(
            flops=6 * b_pad * HP,
            transcendentals=0,
            bytes_accessed=4 * (3 * b_pad + HP * 4),
        ),
    )(xy, const)

    return out[0, :B].reshape(B, 1)


def init_params(key):
    """PyTorch-Linear-style init + host-side float64 fold of fc3.fc4.fc5."""
    ks = jax.random.split(key, 10)

    def lin(kw, kb, fan_in, fan_out):
        bound = 1.0 / np.sqrt(fan_in)
        w = jax.random.uniform(kw, (fan_in, fan_out), jnp.float32, -bound, bound)
        b = jax.random.uniform(kb, (fan_out,), jnp.float32, -bound, bound)
        return w, b

    w1, b1 = lin(ks[0], ks[1], 1, H)
    w2, b2 = lin(ks[2], ks[3], 1, H)
    w3, b3 = lin(ks[4], ks[5], H, H)
    w4, b4 = lin(ks[6], ks[7], H, H)
    w5, b5 = lin(ks[8], ks[9], H, 1)

    raw = (w1, b1, w2, b2, w3, b3, w4, b4, w5, b5)

    # --- algebraic fold (float64 on host, then cast to f32) ------------------
    w3_64 = np.asarray(w3, np.float64)
    w4_64 = np.asarray(w4, np.float64)
    w5_64 = np.asarray(w5, np.float64)          # (H, 1)
    b3_64 = np.asarray(b3, np.float64)
    b4_64 = np.asarray(b4, np.float64)
    b5_64 = np.asarray(b5, np.float64)

    w45 = w4_64 @ w5_64                          # (H, 1)
    v = (w3_64 @ w45)[:, 0]                      # (H,)   = w3 @ w4 @ w5
    c = float(b3_64 @ w45[:, 0] + b4_64 @ w5_64[:, 0] + b5_64[0])

    # --- packed (HP, 4) constants block, hidden on sublanes ------------------
    const = np.zeros((HP, 4), np.float32)
    const[:H, _COL_W1]  = np.asarray(w1[0])      # fc1 weight row (1 -> H)
    const[:H, _COL_W2]  = np.asarray(w2[0])      # fc2 weight row
    const[:H, _COL_B12] = np.asarray(b1 + b2)    # folded first-layer bias
    const[:H, _COL_V]   = v.astype(np.float32)   # folded w3@w4@w5
    # Bias unit in padded row H: relu(0*x + 0*y + 1) = 1, times v[H] = c.
    const[H, _COL_B12] = 1.0
    const[H, _COL_V] = np.float32(c)
    # Rows H+1..HP-1 stay all-zero -> relu(0)*0 contributes nothing.

    return raw, jnp.asarray(const)


def mine_reference(x, y, raw):
    """Pure-JAX reference matching the PyTorch forward exactly (unfolded)."""
    w1, b1, w2, b2, w3, b3, w4, b4, w5, b5 = raw
    h1 = jax.nn.relu(x @ w1 + b1 + y @ w2 + b2)
    h2 = h1 @ w3 + b3
    h3 = h2 @ w4 + b4
    return h3 @ w5 + b5


if __name__ == "__main__":
    key = jax.random.PRNGKey(0)
    k_params, k_x, k_y = jax.random.split(key, 3)

    B = 1000   # not a multiple of 128: exercises padding and the 2-tile grid
    x = jax.random.normal(k_x, (B, 1), jnp.float32)
    y = jax.random.normal(k_y, (B, 1), jnp.float32)

    raw_params, const = init_params(k_params)

    out = jax.block_until_ready(mine_forward(x, y, const))

    ref = mine_reference(x, y, raw_params)
    # Fold was done in float64; residual diff vs. the unfolded f32 chain is a
    # few-1e-6 summation-order effect, well inside this tolerance.
    np.testing.assert_allclose(np.asarray(out), np.asarray(ref),
                               rtol=1e-4, atol=2e-5)

    print("KERNEL_OK")
</pallas_src>

<mosaic_0001>
module attributes {stable_mosaic.version = 11 : i64} {
  func.func @mine_kernel(%arg0: i32, %arg1: memref<2x512xf32, #tpu.memory_space<vmem>>, %arg2: memref<128x4xf32, #tpu.memory_space<vmem>>, %arg3: memref<1x512xf32, #tpu.memory_space<vmem>>) attributes {dimension_semantics = [#tpu.dimension_semantics<parallel>], iteration_bounds = array<i64: 2>, scalar_prefetch = 0 : i64, scratch_operands = 0 : i64, tpu.core_type = #tpu.core_type<tc>, window_params = [{transform_indices = @transform_0, window_bounds = array<i64: 2, 512>}, {pipeline_mode = #tpu.pipeline_mode<synchronous>, transform_indices = @transform_1, window_bounds = array<i64: 128, 4>}, {transform_indices = @transform_2, window_bounds = array<i64: 1, 512>}]} {
    %c0 = arith.constant 0 : index
    %c0_0 = arith.constant 0 : index
    %0 = vector.load %arg1[%c0, %c0_0] : memref<2x512xf32, #tpu.memory_space<vmem>>, vector<1x512xf32>
    %c1 = arith.constant 1 : index
    %c0_1 = arith.constant 0 : index
    %1 = vector.load %arg1[%c1, %c0_1] : memref<2x512xf32, #tpu.memory_space<vmem>>, vector<1x512xf32>
    %c0_2 = arith.constant 0 : index
    %c0_3 = arith.constant 0 : index
    %2 = vector.load %arg2[%c0_2, %c0_3] : memref<128x4xf32, #tpu.memory_space<vmem>>, vector<128x1xf32>
    %c0_4 = arith.constant 0 : index
    %c1_5 = arith.constant 1 : index
    %3 = vector.load %arg2[%c0_4, %c1_5] : memref<128x4xf32, #tpu.memory_space<vmem>>, vector<128x1xf32>
    %c0_6 = arith.constant 0 : index
    %c2 = arith.constant 2 : index
    %4 = vector.load %arg2[%c0_6, %c2] : memref<128x4xf32, #tpu.memory_space<vmem>>, vector<128x1xf32>
    %c0_7 = arith.constant 0 : index
    %c3 = arith.constant 3 : index
    %5 = vector.load %arg2[%c0_7, %c3] : memref<128x4xf32, #tpu.memory_space<vmem>>, vector<128x1xf32>
    %6 = vector.broadcast %0 : vector<1x512xf32> to vector<128x512xf32>
    %7 = vector.broadcast %2 : vector<128x1xf32> to vector<128x512xf32>
    %8 = arith.mulf %6, %7 : vector<128x512xf32>
    %9 = vector.broadcast %1 : vector<1x512xf32> to vector<128x512xf32>
    %10 = vector.broadcast %3 : vector<128x1xf32> to vector<128x512xf32>
    %11 = arith.mulf %9, %10 : vector<128x512xf32>
    %12 = arith.addf %8, %11 : vector<128x512xf32>
    %13 = vector.broadcast %4 : vector<128x1xf32> to vector<128x512xf32>
    %14 = arith.addf %12, %13 : vector<128x512xf32>
    %cst = arith.constant 0.000000e+00 : f32
    %15 = vector.broadcast %cst : f32 to vector<128x512xf32>
    %16 = arith.maximumf %14, %15 : vector<128x512xf32>
    %17 = vector.broadcast %5 : vector<128x1xf32> to vector<128x512xf32>
    %18 = arith.mulf %16, %17 : vector<128x512xf32>
    %cst_8 = arith.constant dense<0.000000e+00> : vector<512xf32>
    %19 = vector.multi_reduction <add>, %18, %cst_8 [0] : vector<128x512xf32> to vector<512xf32>
    %20 = vector.shape_cast %19 : vector<512xf32> to vector<1x512xf32>
    %c0_9 = arith.constant 0 : index
    %c0_10 = arith.constant 0 : index
    %21 = vector.load %arg3[%c0_9, %c0_10] : memref<1x512xf32, #tpu.memory_space<vmem>>, vector<1x512xf32>
    tpu.vector_store %arg3[%c0_9, %c0_10], %20 {strides = array<i32>} : memref<1x512xf32, #tpu.memory_space<vmem>>, vector<1x512xf32>,
    return
  }
  func.func @transform_0(%arg0: i32) -> (i32, i32) {
    %c0_i32 = arith.constant 0 : i32
    %c0_i32_0 = arith.constant 0 : i32
    return %c0_i32, %arg0 : i32, i32
  }
  func.func @transform_1(%arg0: i32) -> (i32, i32) {
    %c0_i32 = arith.constant 0 : i32
    %c0_i32_0 = arith.constant 0 : i32
    %c0_i32_1 = arith.constant 0 : i32
    return %c0_i32, %c0_i32_0 : i32, i32
  }
  func.func @transform_2(%arg0: i32) -> (i32, i32) {
    %c0_i32 = arith.constant 0 : i32
    %c0_i32_0 = arith.constant 0 : i32
    return %c0_i32, %arg0 : i32, i32
  }
}

</mosaic_0001>

<bundles_post_ra>
// kernel: tpu_custom_call.1
= control target key start
LH: loop header
LB: loop body
LE: loop exit
PB: predicated region body
PF: predicated region fallthrough
CT: control target
= control target key end

     0   :  { %7 = vsyncpa [#allocation3], 0  ;;  %s1927_s0 = inlined_call_operand.vmem [shape: f32[2,1024], index: 0, kind: input, shape index: {}]   ;;  %s1928_s1 = inlined_call_operand.vmem [shape: f32[128,4], index: 1, kind: input, shape index: {}]   ;;  %s1929_s2 = inlined_call_operand.hbm [shape: f32[1,1024], index: 2, kind: output, shape index: {}]  }
   0x1   :  { %9 = vsyncpa [#allocation3 + $0x1], 0  ;;  %s1207_s9 = smov 0   ;;  %s1209_s10 = smov 0  }
   0x2   :  { %s1211_s11 = smov 0   ;;  %s1213_s12 = smov 0  }
   0x3 LB: > { %s1228_s13 = sadd.s32 4294967295, %s1184_s12   ;;  %s1054_s14 = sadd.s32 4294967294, %s1184_s12   ;;  %s1184_s12 = sphi %s1213_s12, %s2048_s12   ;;  %s1180_s11 = sphi %s1211_s11, %s2047_s11   ;;  %s1176_s10 = sphi %s1209_s10, %s2046_s10   ;;  %s1172_s9 = sphi %s1207_s9, %s2045_s9  }
   0x4   : > { %s1232_s15 = sadd.s32 1, %s1184_s12   ;;  %s69_s16 = sadd.s32 1, %s1180_s11 }
   0x5   : > { %s66_s17 = ssub.s32 %s1184_s12, %s1232_s15  ;;  %p79_p0 = scmp.ne.s32.totalorder %s1180_s11, %s1176_s10 }
   0x6   : > { %p67_p1 = scmp.eq.s32.totalorder %s66_s17, 0  ;;  %p80_p2 = scmp.eq.s32.totalorder %s1228_s13, 1 }
   0x7   : > { %p85_p3 = scmp.ne.s32.totalorder %s1176_s10, %s1172_s9  ;;  %p86_p4 = scmp.eq.s32.totalorder %s1054_s14, 1 }
   0x8   : > { %s1243_s18 = scalar_select %p67_p1, %s1180_s11, %s69_s16  }
   0x9   : > { %p1245_p5 = por %p80_p2, %p79_p0  ;;  %p1249_p6 = por %p86_p4, %p85_p3 }
   0xa   : > { %p1057_p7 = scmp.ge.s32.totalorder %s1184_s12, 1  ;;  %p116_p8 = scmp.lt.s32.totalorder %s1184_s12, 3 }
   0xc   : > { %p117_p9 = pnand %p1057_p7, %p116_p8 }
   0xe   : > { %120 = sbr.rel (%p117_p9) target bundleno = 324 (0x144), region = 28 }
  0x15   : > { %v1258_v0 = vld [vmem:[%s1928_s1 + $0x10] sm:$0xff]  ;;  %v148_v1 = vld [vmem:[%s1928_s1] sm:$0xff]  ;;  %v1186_v2 = vmov 0   ;;  %v151_v3 = vld [vmem:[%s1928_s1 + $0x18] sm:$0xff]  ;;  %v1187_v17 = vmov 1   ;;  %v1188_v18 = vmov 2   ;;  %v1930_v26 = vlaneseq }
  0x16   : > { %1113 = vset.pattern.permute.xlu1 %v1186_v2  ;;  %1112 = vset.pattern.permute.xlu0 %v1186_v2  ;;  %v149_v4 = vld [vmem:[%s1928_s1 + $0x8] sm:$0xff]  ;;  %v152_v6 = vld [vmem:[%s1928_s1 + $0x20] sm:$0xff]  ;;  %v155_v7 = vld [vmem:[%s1928_s1 + $0x38] sm:$0xff]  ;;  %v1189_v19 = vmov 3   ;;  %s1059_s6 = sshll.u32 %s1228_s13, 2  ;;  %s135_s17 = sand.u32 1, %s1176_s10  }
  0x17   : > { %197 = vperm.xlu1 %1113, %v1258_v0   ;;  %187 = vperm.xlu0 %1112, %v148_v1   ;;  %v153_v5 = vld [vmem:[%s1928_s1 + $0x28] sm:$0xff]  ;;  %v154_v8 = vld [vmem:[%s1928_s1 + $0x30] sm:$0xff]  ;;  %v156_v10 = vld [vmem:[%s1928_s1 + $0x40] sm:$0xff]  ;;  %p139_p10 = scmp.lt.s32.totalorder %s1059_s6, 7  ;;  %v1317_v29 = vshrl.u32 %v1930_v26, 7  ;;  %s1058_s21 = sshll.u32 %s135_s17, 2 }
  0x18   : > { %v157_v9 = vld [vmem:[%s1928_s1 + $0x48] sm:$0xff]  ;;  %v159_v11 = vld [vmem:[%s1928_s1 + $0x58] sm:$0xff]  ;;  %v158_v12 = vld [vmem:[%s1928_s1 + $0x50] sm:$0xff]  ;;  %s1067_s22 = sshll.u32 %s1228_s13, 6  ;;  %s137_s23 = scalar_lea.vmem [#allocation2], %s1058_s21 }
  0x19   : > { %v161_v13 = vld [vmem:[%s1928_s1 + $0x68] sm:$0xff]  ;;  %v160_v14 = vld [vmem:[%s1928_s1 + $0x60] sm:$0xff]  ;;  %v163_v15 = vld [vmem:[%s1928_s1 + $0x78] sm:$0xff]  ;;  %s2050_s6 = smov (!%p139_p10, %s1059_s6), 7  ;;  %1934 = vst [vmem:[#allocation5_spill] sm:$0xff] %v1317_v29  ;;  %v167_v32 = vsub.s32 0, %v1317_v29  ;;  %s1885_s27 = scalar_lea.hbm %s1929_s2, %s1067_s22 }
  0x1a   : > { %v1306_v16 = vld [vmem:[%s1928_s1 + $0x70] sm:$0xff]  ;;  %s1060_s7 = sshll.u32 %s2050_s6, 1  ;;  %v171_v33 = vsub.s32 1, %v1317_v29  ;;  %v175_v34 = vsub.s32 2, %v1317_v29  ;;  %v179_v35 = vsub.s32 3, %v1317_v29  ;;  %s995_s24 = sshll.u32 %s137_s23, 4  ;;  %s1887_s24 = int_to_ptr.vmem [resolvable:$true] %s995_s24 }
  0x1b   : > { %202 = vperm.xlu1 %1113, %v151_v3   ;;  %192 = vperm.xlu0 %1112, %v149_v4   ;;  %s142_s16 = scalar_lea.vmem %s1927_s0, %s1060_s7  ;;  %s981_s28 = scalar_lea.sflag [#allocation3], %s135_s17 }
  0x1c   : > { %v145_v36 = vld [vmem:[%s142_s16] ss:$2 sm:$0xf]  ;;  %v1061_v43 = vld [vmem:[%s142_s16 + $0x1] ss:$2 sm:$0xf] }
  0x1d   : > { %v1328_v39 = vrot.slane %v145_v36, %v167_v32  ;;  %v1330_v40 = vrot.slane %v145_v36, %v171_v33  ;;  %v1332_v41 = vrot.slane %v145_v36, %v175_v34  ;;  %v1334_v42 = vrot.slane %v145_v36, %v179_v35  ;;  %s1122_s29 = scalar_lea.vmem %s1887_s24, 64  ;;  %s1191_s13 = smov [#allocation2]  }
  0x1e   : > { %v1338_v46 = vrot.slane %v1061_v43, %v167_v32  ;;  %v1340_v47 = vrot.slane %v1061_v43, %v171_v33  ;;  %v1342_v48 = vrot.slane %v1061_v43, %v175_v34  ;;  %v1344_v49 = vrot.slane %v1061_v43, %v179_v35  ;;  %p1123_p11 = scmp.ne.s32.totalorder %s1887_s24, %s1122_s29  ;;  %s1126_s30 = sshll.u32 %s1191_s13, 4  ;;  %s1127_s30 = int_to_ptr.vmem [resolvable:$false] %s1126_s30 }
  0x1f   : > { %212 = vperm.xlu1 %1113, %v153_v5   ;;  %207 = vperm.xlu0 %1112, %v152_v6   ;;  %s1128_s3 = scalar_lea.vmem %s1127_s30, 128  ;;  %p1129_p0 = scmp.lt.s32.totalorder %s1887_s24, %s1127_s30 }
  0x20   : > { %p1124_p12 = pnand %p1123_p11, %p1245_p5  ;;  %p1130_p1 = scmp.lt.s32.totalorder %s1128_s3, %s1122_s29 }
  0x22   : > { %p1125_p13 = pneg %p1124_p12  ;;  %p1131_p2 = por %p1130_p1, %p1129_p0 }
  0x23   : > { %222 = vperm.xlu1 %1113, %v155_v7   ;;  %217 = vperm.xlu0 %1112, %v154_v8  }
  0x24   : > { %p1132_p3 = pnand %p1131_p2, %p1125_p13 }
  0x27   : > { %232 = vperm.xlu1 %1113, %v157_v9   ;;  %227 = vperm.xlu0 %1112, %v156_v10  }
  0x2b   : > { %242 = vperm.xlu1 %1113, %v159_v11   ;;  %237 = vperm.xlu0 %1112, %v158_v12  }
  0x2f   : > { %252 = vperm.xlu1 %1113, %v161_v13   ;;  %247 = vperm.xlu0 %1112, %v160_v14  }
  0x33   : > { %262 = vperm.xlu1 %1113, %v163_v15   ;;  %257 = vperm.xlu0 %1112, %v1306_v16  }
  0x37   : > { %1115 = vset.pattern.permute.xlu1 %v1187_v17  ;;  %1114 = vset.pattern.permute.xlu0 %v1187_v17 }
  0x38   : > { %355 = vperm.xlu1 %1115, %v149_v4   ;;  %351 = vperm.xlu0 %1114, %v148_v1  }
  0x3c   : > { %359 = vperm.xlu1 %1115, %v1258_v0   ;;  %363 = vperm.xlu0 %1114, %v151_v3  }
  0x40   : > { %367 = vperm.xlu1 %1115, %v152_v6   ;;  %371 = vperm.xlu0 %1114, %v153_v5  }
  0x44   : > { %375 = vperm.xlu1 %1115, %v154_v8   ;;  %379 = vperm.xlu0 %1114, %v155_v7  }
  0x48   : > { %383 = vperm.xlu1 %1115, %v156_v10   ;;  %387 = vperm.xlu0 %1114, %v157_v9  }
  0x4c   : > { %391 = vperm.xlu1 %1115, %v158_v12   ;;  %395 = vperm.xlu0 %1114, %v159_v11  }
  0x50   : > { %399 = vperm.xlu1 %1115, %v160_v14   ;;  %403 = vperm.xlu0 %1114, %v161_v13  }
  0x54   : > { %407 = vperm.xlu1 %1115, %v1306_v16   ;;  %411 = vperm.xlu0 %1114, %v163_v15  }
  0x58   : > { %1116 = vset.pattern.permute.xlu1 %v1188_v18  ;;  %1117 = vset.pattern.permute.xlu0 %v1188_v18 }
  0x59   : > { %543 = vperm.xlu1 %1116, %v148_v1   ;;  %547 = vperm.xlu0 %1117, %v149_v4  }
  0x5d   : > { %551 = vperm.xlu1 %1116, %v1258_v0   ;;  %1118 = vset.pattern.permute.xlu0 %v1189_v19 }
  0x5e   : > { %735 = vperm.xlu0 %1118, %v148_v1  }
  0x61   : > { %555 = vperm.xlu1 %1116, %v151_v3  }
  0x62   : > { %743 = vperm.xlu0 %1118, %v1258_v0  }
  0x65   : > { %1119 = vset.pattern.permute.xlu1 %v1189_v19 }
  0x66   : > { %739 = vperm.xlu1 %1119, %v149_v4   ;;  %747 = vperm.xlu0 %1118, %v151_v3  }
  0x6a   : > { %1120 = vset.pattern.permute.xlu1 %v1188_v18  ;;  %751 = vperm.xlu0 %1118, %v152_v6  }
  0x6b   : > { %559 = vperm.xlu1 %1120, %v152_v6  }
  0x6e   : > { %755 = vperm.xlu0 %1118, %v153_v5  }
  0x6f   : > { %563 = vperm.xlu1 %1120, %v153_v5  }
  0x72   : > { %759 = vperm.xlu0 %1118, %v154_v8  }
  0x73   : > { %567 = vperm.xlu1 %1120, %v154_v8  }
  0x76   : > { %763 = vperm.xlu0 %1118, %v155_v7  }
  0x77   : > { %571 = vperm.xlu1 %1120, %v155_v7  }
  0x7a   : > { %767 = vperm.xlu0 %1118, %v156_v10  }
  0x7b   : > { %575 = vperm.xlu1 %1120, %v156_v10  }
  0x7e   : > { %771 = vperm.xlu0 %1118, %v157_v9  }
  0x7f   : > { %579 = vperm.xlu1 %1120, %v157_v9  }
  0x82   : > { %775 = vperm.xlu0 %1118, %v158_v12  }
  0x83   : > { %583 = vperm.xlu1 %1120, %v158_v12  }
  0x86   : > { %779 = vperm.xlu0 %1118, %v159_v11  }
  0x87   : > { %587 = vperm.xlu1 %1120, %v159_v11  }
  0x8a   : > { %783 = vperm.xlu0 %1118, %v160_v14  }
  0x8b   : > { %591 = vperm.xlu1 %1120, %v160_v14  }
  0x8e   : > { %787 = vperm.xlu0 %1118, %v161_v13  }
  0x8f   : > { %595 = vperm.xlu1 %1120, %v161_v13  }
  0x92   : > { %795 = vperm.xlu0 %1118, %v163_v15  }
  0x93   : > { %599 = vperm.xlu1 %1120, %v1306_v16  }
  0x96   : > { %v198_v20 = vpop.permute.xlu1 %197  ;;  %v188_v21 = vpop.permute.xlu0 %187 }
  0x97   : > { %603 = vperm.xlu1 %1120, %v163_v15   ;;  %v1347_v50 = vmul.f32 %v198_v20, %v1328_v39  ;;  %v1350_v51 = vmul.f32 %v198_v20, %v1330_v40  ;;  %v1353_v52 = vmul.f32 %v198_v20, %v1332_v41  ;;  %v1356_v53 = vmul.f32 %v198_v20, %v1334_v42 }
  0x98   : > { %v1359_v54 = vmul.f32 %v188_v21, %v1328_v39  ;;  %v1362_v55 = vmul.f32 %v188_v21, %v1330_v40  ;;  %v1365_v56 = vmul.f32 %v188_v21, %v1332_v41  ;;  %v1368_v57 = vmul.f32 %v188_v21, %v1334_v42 }
  0x9a   : > { %v203_v22 = vpop.permute.xlu1 %202  ;;  %v193_v23 = vpop.permute.xlu0 %192 }
  0x9b   : > { %1121 = vset.pattern.permute.xlu1 %v1189_v19  ;;  %v1371_v58 = vmul.f32 %v203_v22, %v1328_v39  ;;  %v1374_v59 = vmul.f32 %v203_v22, %v1330_v40  ;;  %v1377_v60 = vmul.f32 %v203_v22, %v1332_v41  ;;  %v1380_v61 = vmul.f32 %v203_v22, %v1334_v42 }
  0x9c   : > { %791 = vperm.xlu1 %1121, %v1306_v16   ;;  %v1383_v62 = vmul.f32 %v193_v23, %v1328_v39  ;;  %v1386_v63 = vmul.f32 %v193_v23, %v1330_v40  ;;  %v1389_v0 = vmul.f32 %v193_v23, %v1332_v41  ;;  %v1392_v1 = vmul.f32 %v193_v23, %v1334_v42 }
  0x9e   : > { %v213_v24 = vpop.permute.xlu1 %212  ;;  %v208_v25 = vpop.permute.xlu0 %207 }
  0x9f   : > { %v1395_v4 = vmul.f32 %v213_v24, %v1328_v39  ;;  %v1398_v5 = vmul.f32 %v213_v24, %v1330_v40  ;;  %v1401_v6 = vmul.f32 %v213_v24, %v1332_v41  ;;  %v1404_v7 = vmul.f32 %v213_v24, %v1334_v42 }
  0xa0   : > { %v1407_v8 = vmul.f32 %v208_v25, %v1328_v39  ;;  %v1410_v9 = vmul.f32 %v208_v25, %v1330_v40  ;;  %v1413_v10 = vmul.f32 %v208_v25, %v1332_v41  ;;  %v1416_v11 = vmul.f32 %v208_v25, %v1334_v42 }
  0xa2   : > { %v223_v27 = vpop.permute.xlu1 %222  ;;  %v218_v28 = vpop.permute.xlu0 %217 }
  0xa3   : > { %v1419_v12 = vmul.f32 %v223_v27, %v1328_v39  ;;  %v1422_v13 = vmul.f32 %v223_v27, %v1330_v40  ;;  %v1425_v14 = vmul.f32 %v223_v27, %v1332_v41  ;;  %v1428_v15 = vmul.f32 %v223_v27, %v1334_v42 }
  0xa4   : > { %v1431_v16 = vmul.f32 %v218_v28, %v1328_v39  ;;  %v1434_v17 = vmul.f32 %v218_v28, %v1330_v40  ;;  %v1437_v18 = vmul.f32 %v218_v28, %v1332_v41  ;;  %v1440_v19 = vmul.f32 %v218_v28, %v1334_v42 }
  0xa6   : > { %v233_v30 = vpop.permute.xlu1 %232  ;;  %v228_v31 = vpop.permute.xlu0 %227 }
  0xa7   : > { %v1443_v20 = vmul.f32 %v233_v30, %v1328_v39  ;;  %v1446_v21 = vmul.f32 %v233_v30, %v1330_v40  ;;  %v1449_v22 = vmul.f32 %v233_v30, %v1332_v41  ;;  %v1452_v23 = vmul.f32 %v233_v30, %v1334_v42 }
  0xa8   : > { %v1455_v27 = vmul.f32 %v228_v31, %v1328_v39  ;;  %v1458_v28 = vmul.f32 %v228_v31, %v1330_v40  ;;  %v1461_v32 = vmul.f32 %v228_v31, %v1332_v41  ;;  %v1464_v33 = vmul.f32 %v228_v31, %v1334_v42 }
  0xa9   : > { %1935 = vst [vmem:[#allocation6_spill] sm:$0xff] %v1443_v20  ;;  %1936 = vst [vmem:[#allocation7_spill] sm:$0xff] %v1446_v21 }
  0xaa   : > { %v243_v37 = vpop.permute.xlu1 %242  ;;  %v1326_v38 = vpop.permute.xlu0 %237  ;;  %1937 = vst [vmem:[#allocation8_spill] sm:$0xff] %v1449_v22  ;;  %1938 = vst [vmem:[#allocation9_spill] sm:$0xff] %v1452_v23 }
  0xab   : > { %1939 = vst [vmem:[#allocation10_spill] sm:$0xff] %v1464_v33  ;;  %v1467_v34 = vmul.f32 %v243_v37, %v1328_v39  ;;  %v1470_v30 = vmul.f32 %v243_v37, %v1330_v40  ;;  %v1473_v35 = vmul.f32 %v243_v37, %v1332_v41  ;;  %v1476_v36 = vmul.f32 %v243_v37, %v1334_v42 }
  0xac   : > { %v1480_v43 = vmul.f32 %v1326_v38, %v1328_v39  ;;  %v1484_v31 = vmul.f32 %v1326_v38, %v1330_v40  ;;  %v1488_v26 = vmul.f32 %v1326_v38, %v1332_v41  ;;  %v1492_v29 = vmul.f32 %v1326_v38, %v1334_v42 }
  0xad   : > { %1940 = vst [vmem:[#allocation11_spill] sm:$0xff] %v1467_v34  ;;  %1941 = vst [vmem:[#allocation12_spill] sm:$0xff] %v1470_v30 }
  0xae   : > { %v253_v44 = vpop.permute.xlu1 %252  ;;  %v1336_v45 = vpop.permute.xlu0 %247  ;;  %1942 = vst [vmem:[#allocation13_spill] sm:$0xff] %v1473_v35  ;;  %1943 = vst [vmem:[#allocation14_spill] sm:$0xff] %v1476_v36 }
  0xaf   : > { %1944 = vst [vmem:[#allocation15_spill] sm:$0xff] %v1480_v43  ;;  %1945 = vst [vmem:[#allocation16_spill] sm:$0xff] %v1484_v31  ;;  %v1495_v35 = vmul.f32 %v253_v44, %v1328_v39  ;;  %v1498_v37 = vmul.f32 %v253_v44, %v1330_v40  ;;  %v1501_v36 = vmul.f32 %v253_v44, %v1332_v41 }
  0xb0   : > { %1946 = vst [vmem:[#allocation17_spill] sm:$0xff] %v1488_v26  ;;  %1947 = vst [vmem:[#allocation18_spill] sm:$0xff] %v1492_v29  ;;  %v1504_v30 = vmul.f32 %v253_v44, %v1334_v42  ;;  %v1508_v26 = vmul.f32 %v1336_v45, %v1328_v39  ;;  %v1512_v38 = vmul.f32 %v1336_v45, %v1330_v40 }
  0xb1   : > { %1948 = vst [vmem:[#allocation19_spill] sm:$0xff] %v1495_v35  ;;  %1949 = vst [vmem:[#allocation20_spill] sm:$0xff] %v1498_v37  ;;  %v1516_v35 = vmul.f32 %v1336_v45, %v1332_v41 }
  0xb2   : > { %v263_v2 = vpop.permute.xlu1 %262  ;;  %v258_v3 = vpop.permute.xlu0 %257  ;;  %1950 = vst [vmem:[#allocation21_spill] sm:$0xff] %v1501_v36  ;;  %1951 = vst [vmem:[#allocation22_spill] sm:$0xff] %v1504_v30  ;;  %v1520_v36 = vmul.f32 %v1336_v45, %v1334_v42 }
  0xb3   : > { %1952 = vst [vmem:[#allocation23_spill] sm:$0xff] %v1508_v26  ;;  %1953 = vst [vmem:[#allocation24_spill] sm:$0xff] %v1512_v38  ;;  %v1531_v23 = vmul.f32 %v263_v2, %v1328_v39  ;;  %v1534_v45 = vmul.f32 %v263_v2, %v1330_v40  ;;  %v1540_v22 = vmul.f32 %v263_v2, %v1334_v42 }
  0xb4   : > { %1954 = vst [vmem:[#allocation25_spill] sm:$0xff] %v1516_v35  ;;  %1955 = vst [vmem:[#allocation26_spill] sm:$0xff] %v1520_v36  ;;  %v1537_v36 = vmul.f32 %v263_v2, %v1332_v41  ;;  %v1543_v20 = vmul.f32 %v258_v3, %v1328_v39  ;;  %v1546_v33 = vmul.f32 %v258_v3, %v1330_v40 }
  0xb5   : > { %1956 = vst [vmem:[#allocation27_spill] sm:$0xff] %v1531_v23  ;;  %1957 = vst [vmem:[#allocation28_spill] sm:$0xff] %v1534_v45  ;;  %v1552_v23 = vmul.f32 %v258_v3, %v1334_v42 }
  0xb6   : > { %1958 = vst [vmem:[#allocation29_spill] sm:$0xff] %v1537_v36  ;;  %1959 = vst [vmem:[#allocation30_spill] sm:$0xff] %v1540_v22 }
  0xb7   : > { %v356_v24 = vpop.permute.xlu1 %355  ;;  %v352_v25 = vpop.permute.xlu0 %351  ;;  %1960 = vst [vmem:[#allocation31_spill] sm:$0xff] %v1543_v20  ;;  %1961 = vst [vmem:[#allocation32_spill] sm:$0xff] %v1546_v33 }
  0xb8   : > { %v418_v44 = vmul.f32 %v356_v24, %v1338_v46  ;;  %v419_v30 = vmul.f32 %v356_v24, %v1340_v47  ;;  %v420_v37 = vmul.f32 %v356_v24, %v1342_v48  ;;  %v421_v26 = vmul.f32 %v356_v24, %v1344_v49  ;;  %1963 = vst [vmem:[#allocation34_spill] sm:$0xff] %v1552_v23 }
  0xb9   : > { %v414_v29 = vmul.f32 %v352_v25, %v1338_v46  ;;  %v415_v38 = vmul.f32 %v352_v25, %v1340_v47  ;;  %v416_v43 = vmul.f32 %v352_v25, %v1342_v48  ;;  %v417_v35 = vmul.f32 %v352_v25, %v1344_v49 }
  0xba   : > { %v1549_v25 = vmul.f32 %v258_v3, %v1332_v41  ;;  %v1555_v45 = vadd.f32 %v418_v44, %v1383_v62  ;;  %v1558_v2 = vadd.f32 %v419_v30, %v1386_v63  ;;  %v1561_v22 = vadd.f32 %v420_v37, %v1389_v0 }
  0xbb   : > { %v360_v34 = vpop.permute.xlu1 %359  ;;  %v364_v31 = vpop.permute.xlu0 %363  ;;  %v1564_v39 = vadd.f32 %v421_v26, %v1392_v1  ;;  %v1567_v40 = vadd.f32 %v414_v29, %v1359_v54  ;;  %v1570_v41 = vadd.f32 %v415_v38, %v1362_v55  ;;  %v1573_v42 = vadd.f32 %v416_v43, %v1365_v56 }
  0xbc   : > { %1962 = vst [vmem:[#allocation33_spill] sm:$0xff] %v1549_v25  ;;  %1964 = vst [vmem:[#allocation35_spill] sm:$0xff] %v1561_v22  ;;  %v1576_v62 = vadd.f32 %v417_v35, %v1368_v57  ;;  %v422_v63 = vmul.f32 %v360_v34, %v1338_v46  ;;  %v423_v0 = vmul.f32 %v360_v34, %v1340_v47 }
  0xbd   : > { %1965 = vst [vmem:[#allocation36_spill] sm:$0xff] %v1564_v39  ;;  %v424_v3 = vmul.f32 %v360_v34, %v1342_v48  ;;  %v425_v26 = vmul.f32 %v360_v34, %v1344_v49  ;;  %v426_v54 = vmul.f32 %v364_v31, %v1338_v46  ;;  %v427_v55 = vmul.f32 %v364_v31, %v1340_v47 }
  0xbe   : > { %v428_v56 = vmul.f32 %v364_v31, %v1342_v48  ;;  %v429_v30 = vmul.f32 %v364_v31, %v1344_v49  ;;  %v1595_v31 = vadd.f32 %v422_v63, %v1347_v50  ;;  %v1598_v33 = vadd.f32 %v423_v0, %v1350_v51 }
  0xbf   : > { %v368_v24 = vpop.permute.xlu1 %367  ;;  %v372_v21 = vpop.permute.xlu0 %371  ;;  %v1601_v20 = vadd.f32 %v424_v3, %v1353_v52  ;;  %v1607_v39 = vadd.f32 %v426_v54, %v1371_v58  ;;  %v1610_v22 = vadd.f32 %v427_v55, %v1374_v59 }
  0xc0   : > { %v430_v57 = vmul.f32 %v368_v24, %v1338_v46  ;;  %v431_v35 = vmul.f32 %v368_v24, %v1340_v47  ;;  %v432_v43 = vmul.f32 %v368_v24, %v1342_v48  ;;  %v433_v37 = vmul.f32 %v368_v24, %v1344_v49 }
  0xc1   : > { %v434_v34 = vmul.f32 %v372_v21, %v1338_v46  ;;  %v435_v38 = vmul.f32 %v372_v21, %v1340_v47  ;;  %v436_v44 = vmul.f32 %v372_v21, %v1342_v48  ;;  %v437_v36 = vmul.f32 %v372_v21, %v1344_v49 }
  0xc2   : > { %v1604_v24 = vadd.f32 %v425_v26, %v1356_v53  ;;  %v1613_v21 = vadd.f32 %v428_v56, %v1377_v60  ;;  %v1616_v50 = vadd.f32 %v429_v30, %v1380_v61  ;;  %v1619_v51 = vadd.f32 %v430_v57, %v1407_v8 }
  0xc3   : > { %v376_v1 = vpop.permute.xlu1 %375  ;;  %v380_v29 = vpop.permute.xlu0 %379  ;;  %v1622_v52 = vadd.f32 %v431_v35, %v1410_v9  ;;  %v1625_v53 = vadd.f32 %v432_v43, %v1413_v10  ;;  %v1628_v58 = vadd.f32 %v433_v37, %v1416_v11  ;;  %v1631_v59 = vadd.f32 %v434_v34, %v1395_v4 }
  0xc4   : > { %v1634_v60 = vadd.f32 %v435_v38, %v1398_v5  ;;  %v1637_v61 = vadd.f32 %v436_v44, %v1401_v6  ;;  %v1640_v8 = vadd.f32 %v437_v36, %v1404_v7  ;;  %v438_v9 = vmul.f32 %v376_v1, %v1338_v46 }
  0xc5   : > { %v439_v10 = vmul.f32 %v376_v1, %v1340_v47  ;;  %v440_v63 = vmul.f32 %v376_v1, %v1342_v48  ;;  %v441_v11 = vmul.f32 %v376_v1, %v1344_v49  ;;  %v442_v3 = vmul.f32 %v380_v29, %v1338_v46 }
  0xc6   : > { %v443_v5 = vmul.f32 %v380_v29, %v1340_v47  ;;  %v444_v6 = vmul.f32 %v380_v29, %v1342_v48  ;;  %v445_v26 = vmul.f32 %v380_v29, %v1344_v49  ;;  %v1659_v29 = vadd.f32 %v438_v9, %v1431_v16 }
  0xc7   : > { %v384_v23 = vpop.permute.xlu1 %383  ;;  %v388_v25 = vpop.permute.xlu0 %387  ;;  %v1662_v37 = vadd.f32 %v439_v10, %v1434_v17  ;;  %v1665_v34 = vadd.f32 %v440_v63, %v1437_v18  ;;  %v1671_v38 = vadd.f32 %v442_v3, %v1419_v12  ;;  %v1972_v12 = vld [vmem:[#allocation10_spill] sm:$0xff] }
  0xc8   : > { %v446_v7 = vmul.f32 %v384_v23, %v1338_v46  ;;  %v447_v36 = vmul.f32 %v384_v23, %v1340_v47  ;;  %v448_v54 = vmul.f32 %v384_v23, %v1342_v48  ;;  %v449_v55 = vmul.f32 %v384_v23, %v1344_v49 }
  0xc9   : > { %v450_v1 = vmul.f32 %v388_v25, %v1338_v46  ;;  %v451_v56 = vmul.f32 %v388_v25, %v1340_v47  ;;  %v452_v30 = vmul.f32 %v388_v25, %v1342_v48  ;;  %v453_v57 = vmul.f32 %v388_v25, %v1344_v49 }
  0xca   : > { %v1668_v23 = vadd.f32 %v441_v11, %v1440_v19  ;;  %v1674_v44 = vadd.f32 %v443_v5, %v1422_v13  ;;  %v1677_v25 = vadd.f32 %v444_v6, %v1425_v14  ;;  %v1680_v16 = vadd.f32 %v445_v26, %v1428_v15  ;;  %v1974_v13 = vld [vmem:[#allocation6_spill] sm:$0xff]  ;;  %v1976_v14 = vld [vmem:[#allocation7_spill] sm:$0xff]  ;;  %v1978_v15 = vld [vmem:[#allocation8_spill] sm:$0xff] }
  0xcb   : > { %v392_v0 = vpop.permute.xlu1 %391  ;;  %v396_v4 = vpop.permute.xlu0 %395  ;;  %v1683_v17 = vadd.f32 %v446_v7, %v1455_v27  ;;  %v1686_v18 = vadd.f32 %v447_v36, %v1458_v28  ;;  %v1689_v19 = vadd.f32 %v448_v54, %v1461_v32  ;;  %v1692_v9 = vadd.f32 %v449_v55, %v1972_v12  ;;  %v1980_v27 = vld [vmem:[#allocation9_spill] sm:$0xff] }
  0xcc   : > { %1966 = vst [vmem:[#allocation37_spill] sm:$0xff] %v1674_v44  ;;  %1967 = vst [vmem:[#allocation38_spill] sm:$0xff] %v1677_v25  ;;  %v1695_v10 = vadd.f32 %v450_v1, %v1974_v13  ;;  %v1698_v63 = vadd.f32 %v451_v56, %v1976_v14  ;;  %v1701_v11 = vadd.f32 %v452_v30, %v1978_v15  ;;  %v1988_v25 = vld [vmem:[#allocation12_spill] sm:$0xff] }
  0xcd   : > { %1968 = vst [vmem:[#allocation39_spill] sm:$0xff] %v1680_v16  ;;  %1969 = vst [vmem:[#allocation40_spill] sm:$0xff] %v1683_v17  ;;  %v1704_v3 = vadd.f32 %v453_v57, %v1980_v27  ;;  %v454_v28 = vmul.f32 %v392_v0, %v1338_v46  ;;  %v455_v32 = vmul.f32 %v392_v0, %v1340_v47  ;;  %v1982_v27 = vld [vmem:[#allocation15_spill] sm:$0xff] }
  0xce   : > { %1970 = vst [vmem:[#allocation41_spill] sm:$0xff] %v1686_v18  ;;  %1971 = vst [vmem:[#allocation42_spill] sm:$0xff] %v1689_v19  ;;  %v456_v5 = vmul.f32 %v392_v0, %v1342_v48  ;;  %v457_v6 = vmul.f32 %v392_v0, %v1344_v49  ;;  %v458_v36 = vmul.f32 %v396_v4, %v1338_v46  ;;  %v1987_v17 = vld [vmem:[#allocation11_spill] sm:$0xff] }
  0xcf   : > { %v400_v35 = vpop.permute.xlu1 %399  ;;  %v404_v43 = vpop.permute.xlu0 %403  ;;  %1973 = vst [vmem:[#allocation10_spill] sm:$0xff] %v1692_v9  ;;  %1975 = vst [vmem:[#allocation6_spill] sm:$0xff] %v1695_v10  ;;  %v459_v54 = vmul.f32 %v396_v4, %v1340_v47  ;;  %v460_v55 = vmul.f32 %v396_v4, %v1342_v48  ;;  %v461_v1 = vmul.f32 %v396_v4, %v1344_v49  ;;  %v1983_v4 = vld [vmem:[#allocation16_spill] sm:$0xff]  ;;  %v1985_v9 = vld [vmem:[#allocation18_spill] sm:$0xff] }
  0xd0   : > { %1977 = vst [vmem:[#allocation7_spill] sm:$0xff] %v1698_v63  ;;  %1979 = vst [vmem:[#allocation8_spill] sm:$0xff] %v1701_v11  ;;  %v462_v56 = vmul.f32 %v400_v35, %v1338_v46  ;;  %v463_v30 = vmul.f32 %v400_v35, %v1340_v47  ;;  %v464_v57 = vmul.f32 %v400_v35, %v1342_v48  ;;  %v1984_v63 = vld [vmem:[#allocation17_spill] sm:$0xff] }
  0xd1   : > { %1981 = vst [vmem:[#allocation9_spill] sm:$0xff] %v1704_v3  ;;  %v465_v12 = vmul.f32 %v400_v35, %v1344_v49  ;;  %v466_v0 = vmul.f32 %v404_v43, %v1338_v46  ;;  %v467_v13 = vmul.f32 %v404_v43, %v1340_v47  ;;  %v468_v14 = vmul.f32 %v404_v43, %v1342_v48 }
  0xd2   : > { %v469_v15 = vmul.f32 %v404_v43, %v1344_v49  ;;  %v1723_v3 = vadd.f32 %v454_v28, %v1982_v27  ;;  %v1726_v11 = vadd.f32 %v455_v32, %v1983_v4  ;;  %v1729_v10 = vadd.f32 %v456_v5, %v1984_v63  ;;  %v1989_v43 = vld [vmem:[#allocation13_spill] sm:$0xff]  ;;  %v1990_v27 = vld [vmem:[#allocation14_spill] sm:$0xff]  ;;  %v1991_v4 = vld [vmem:[#allocation23_spill] sm:$0xff] }
  0xd3   : > { %v408_v26 = vpop.permute.xlu1 %407  ;;  %v412_v7 = vpop.permute.xlu0 %411  ;;  %v1732_v19 = vadd.f32 %v457_v6, %v1985_v9  ;;  %v1735_v16 = vadd.f32 %v458_v36, %v1987_v17  ;;  %v1738_v44 = vadd.f32 %v459_v54, %v1988_v25  ;;  %v1741_v28 = vadd.f32 %v460_v55, %v1989_v43  ;;  %v1992_v5 = vld [vmem:[#allocation24_spill] sm:$0xff]  ;;  %v1994_v6 = vld [vmem:[#allocation25_spill] sm:$0xff]  ;;  %v1996_v17 = vld [vmem:[#allocation26_spill] sm:$0xff] }
  0xd4   : > { %v1744_v32 = vadd.f32 %v461_v1, %v1990_v27  ;;  %v1747_v63 = vadd.f32 %v462_v56, %v1991_v4  ;;  %v1750_v9 = vadd.f32 %v463_v30, %v1992_v5  ;;  %v1756_v36 = vadd.f32 %v465_v12, %v1996_v17  ;;  %v1998_v25 = vld [vmem:[#allocation19_spill] sm:$0xff]  ;;  %v2000_v55 = vld [vmem:[#allocation20_spill] sm:$0xff]  ;;  %v2002_v1 = vld [vmem:[#allocation21_spill] sm:$0xff] }
  0xd5   : > { %1986 = vst [vmem:[#allocation15_spill] sm:$0xff] %v1732_v19  ;;  %v1753_v19 = vadd.f32 %v464_v57, %v1994_v6  ;;  %v1759_v54 = vadd.f32 %v466_v0, %v1998_v25  ;;  %v1762_v43 = vadd.f32 %v467_v13, %v2000_v55  ;;  %v1765_v27 = vadd.f32 %v468_v14, %v2002_v1  ;;  %v2004_v56 = vld [vmem:[#allocation22_spill] sm:$0xff]  ;;  %v2010_v1 = vld [vmem:[#allocation35_spill] sm:$0xff] }
  0xd6   : > { %1993 = vst [vmem:[#allocation16_spill] sm:$0xff] %v1750_v9  ;;  %1997 = vst [vmem:[#allocation18_spill] sm:$0xff] %v1756_v36  ;;  %v1768_v4 = vadd.f32 %v469_v15, %v2004_v56  ;;  %v1771_v30 = vmul.f32 %v408_v26, %v1338_v46  ;;  %v1774_v57 = vmul.f32 %v408_v26, %v1340_v47 }
  0xd7   : > { %1995 = vst [vmem:[#allocation17_spill] sm:$0xff] %v1753_v19  ;;  %1999 = vst [vmem:[#allocation11_spill] sm:$0xff] %v1759_v54  ;;  %v1777_v12 = vmul.f32 %v408_v26, %v1342_v48  ;;  %v1780_v0 = vmul.f32 %v408_v26, %v1344_v49  ;;  %v1787_v17 = vmul.f32 %v412_v7, %v1338_v46 }
  0xd8   : > { %v544_v35 = vpop.permute.xlu1 %543  ;;  %v548_v18 = vpop.permute.xlu0 %547  ;;  %2001 = vst [vmem:[#allocation12_spill] sm:$0xff] %v1762_v43  ;;  %2003 = vst [vmem:[#allocation13_spill] sm:$0xff] %v1765_v27  ;;  %v1790_v25 = vmul.f32 %v412_v7, %v1340_v47  ;;  %v1793_v55 = vmul.f32 %v412_v7, %v1342_v48  ;;  %v1796_v26 = vmul.f32 %v412_v7, %v1344_v49 }
  0xd9   : > { %2005 = vst [vmem:[#allocation14_spill] sm:$0xff] %v1768_v4  ;;  %v606_v13 = vadd.f32 %v544_v35, %v1567_v40  ;;  %v607_v14 = vadd.f32 %v544_v35, %v1570_v41  ;;  %v608_v5 = vadd.f32 %v544_v35, %v1573_v42  ;;  %v609_v15 = vadd.f32 %v544_v35, %v1576_v62  ;;  %v2011_v35 = vld [vmem:[#allocation36_spill] sm:$0xff] }
  0xda   : > { %2006 = vst [vmem:[#allocation23_spill] sm:$0xff] %v1787_v17  ;;  %2007 = vst [vmem:[#allocation24_spill] sm:$0xff] %v1790_v25  ;;  %v610_v41 = vadd.f32 %v548_v18, %v1555_v45  ;;  %v611_v42 = vadd.f32 %v548_v18, %v1558_v2  ;;  %v612_v62 = vadd.f32 %v548_v18, %v2010_v1 }
  0xdb   : > { %2008 = vst [vmem:[#allocation25_spill] sm:$0xff] %v1793_v55  ;;  %2009 = vst [vmem:[#allocation26_spill] sm:$0xff] %v1796_v26  ;;  %v613_v56 = vadd.f32 %v548_v18, %v2011_v35  ;;  %v670_v55 = vmax.f32 %v606_v13, 0.0  ;;  %v671_v49 = vmax.f32 %v607_v14, 0.0  ;;  %v672_v7 = vmax.f32 %v608_v5, 0.0 }
  0xdc   : > { %v552_v6 = vpop.permute.xlu1 %551  ;;  %v673_v26 = vmax.f32 %v609_v15, 0.0  ;;  %v674_v35 = vmax.f32 %v610_v41, 0.0  ;;  %v676_v4 = vmax.f32 %v612_v62, 0.0 }
  0xdd   : > { %v736_v40 = vpop.permute.xlu0 %735  ;;  %v614_v46 = vadd.f32 %v552_v6, %v1595_v31  ;;  %v615_v47 = vadd.f32 %v552_v6, %v1598_v33  ;;  %v616_v25 = vadd.f32 %v552_v6, %v1601_v20  ;;  %v617_v48 = vadd.f32 %v552_v6, %v1604_v24 }
  0xde   : > { %v675_v33 = vmax.f32 %v611_v42, 0.0  ;;  %v677_v20 = vmax.f32 %v613_v56, 0.0  ;;  %v798_v5 = vmul.f32 %v736_v40, %v670_v55  ;;  %v799_v15 = vmul.f32 %v736_v40, %v671_v49 }
  0xdf   : > { %v678_v27 = vmax.f32 %v614_v46, 0.0  ;;  %v679_v24 = vmax.f32 %v615_v47, 0.0  ;;  %v680_v13 = vmax.f32 %v616_v25, 0.0  ;;  %v681_v14 = vmax.f32 %v617_v48, 0.0 }
  0xe0   : > { %v556_v17 = vpop.permute.xlu1 %555  ;;  %v800_v6 = vmul.f32 %v736_v40, %v672_v7  ;;  %v801_v43 = vmul.f32 %v736_v40, %v673_v26 }
  0xe1   : > { %v618_v45 = vadd.f32 %v556_v17, %v1607_v39  ;;  %v619_v2 = vadd.f32 %v556_v17, %v1610_v22  ;;  %v620_v1 = vadd.f32 %v556_v17, %v1613_v21  ;;  %v621_v18 = vadd.f32 %v556_v17, %v1616_v50  ;;  %v744_v31 = vpop.permute.xlu0 %743 }
  0xe2   : > { %v806_v62 = vmul.f32 %v744_v31, %v678_v27  ;;  %v807_v56 = vmul.f32 %v744_v31, %v679_v24  ;;  %v808_v46 = vmul.f32 %v744_v31, %v680_v13  ;;  %v809_v47 = vmul.f32 %v744_v31, %v681_v14 }
  0xe3   : > { %v682_v39 = vmax.f32 %v618_v45, 0.0  ;;  %v683_v54 = vmax.f32 %v619_v2, 0.0  ;;  %v684_v22 = vmax.f32 %v620_v1, 0.0  ;;  %v685_v36 = vmax.f32 %v621_v18, 0.0 }
  0xe5   : > { %v740_v21 = vpop.permute.xlu1 %739  ;;  %v748_v19 = vpop.permute.xlu0 %747 }
  0xe6   : > { %v802_v50 = vmul.f32 %v740_v21, %v674_v35  ;;  %v803_v17 = vmul.f32 %v740_v21, %v675_v33  ;;  %v804_v41 = vmul.f32 %v740_v21, %v676_v4  ;;  %v805_v42 = vmul.f32 %v740_v21, %v677_v20 }
  0xe7   : > { %v810_v7 = vmul.f32 %v748_v19, %v682_v39  ;;  %v811_v26 = vmul.f32 %v748_v19, %v683_v54  ;;  %v812_v40 = vmul.f32 %v748_v19, %v684_v22  ;;  %v813_v45 = vmul.f32 %v748_v19, %v685_v36  ;;  %v2012_v39 = vld [vmem:[#allocation31_spill] sm:$0xff] }
  0xe8   : > { %v862_v25 = vadd.f32 %v802_v50, %v798_v5  ;;  %v883_v48 = vadd.f32 %v803_v17, %v799_v15  ;;  %v904_v55 = vadd.f32 %v804_v41, %v800_v6  ;;  %v925_v49 = vadd.f32 %v805_v42, %v801_v43 }
  0xe9   : > { %v752_v2 = vpop.permute.xlu0 %751  ;;  %v1816_v22 = vadd.f32 %v1771_v30, %v2012_v39 }
  0xea   : > { %v863_v1 = vadd.f32 %v862_v25, %v806_v62  ;;  %v884_v18 = vadd.f32 %v883_v48, %v807_v56  ;;  %v905_v9 = vadd.f32 %v904_v55, %v808_v46  ;;  %v926_v35 = vadd.f32 %v925_v49, %v809_v47  ;;  %v560_v33 = vpop.permute.xlu1 %559 }
  0xeb   : > { %v622_v4 = vadd.f32 %v560_v33, %v1619_v51  ;;  %v623_v27 = vadd.f32 %v560_v33, %v1622_v52  ;;  %v624_v31 = vadd.f32 %v560_v33, %v1625_v53  ;;  %v625_v20 = vadd.f32 %v560_v33, %v1628_v58  ;;  %v2013_v51 = vld [vmem:[#allocation32_spill] sm:$0xff]  ;;  %v2014_v53 = vld [vmem:[#allocation33_spill] sm:$0xff] }
  0xec   : > { %v864_v24 = vadd.f32 %v863_v1, %v810_v7  ;;  %v885_v43 = vadd.f32 %v884_v18, %v811_v26  ;;  %v906_v13 = vadd.f32 %v905_v9, %v812_v40  ;;  %v927_v54 = vadd.f32 %v926_v35, %v813_v45  ;;  %v2015_v9 = vld [vmem:[#allocation34_spill] sm:$0xff] }
  0xed   : > { %v686_v14 = vmax.f32 %v622_v4, 0.0  ;;  %v687_v19 = vmax.f32 %v623_v27, 0.0  ;;  %v688_v36 = vmax.f32 %v624_v31, 0.0  ;;  %v689_v5 = vmax.f32 %v625_v20, 0.0  ;;  %v756_v15 = vpop.permute.xlu0 %755 }
  0xee   : > { %v564_v6 = vpop.permute.xlu1 %563  ;;  %v1820_v52 = vadd.f32 %v1774_v57, %v2013_v51  ;;  %v1824_v58 = vadd.f32 %v1777_v12, %v2014_v53  ;;  %v1828_v21 = vadd.f32 %v1780_v0, %v2015_v9 }
  0xef   : > { %v814_v50 = vmul.f32 %v752_v2, %v686_v14  ;;  %v815_v17 = vmul.f32 %v752_v2, %v687_v19  ;;  %v816_v41 = vmul.f32 %v752_v2, %v688_v36  ;;  %v817_v42 = vmul.f32 %v752_v2, %v689_v5  ;;  %v2016_v14 = vld [vmem:[#allocation37_spill] sm:$0xff]  ;;  %v2017_v36 = vld [vmem:[#allocation38_spill] sm:$0xff] }
  0xf0   : > { %v626_v62 = vadd.f32 %v564_v6, %v1631_v59  ;;  %v627_v30 = vadd.f32 %v564_v6, %v1634_v60  ;;  %v628_v56 = vadd.f32 %v564_v6, %v1637_v61  ;;  %v629_v57 = vadd.f32 %v564_v6, %v1640_v8 }
  0xf1   : > { %v865_v46 = vadd.f32 %v864_v24, %v814_v50  ;;  %v886_v47 = vadd.f32 %v885_v43, %v815_v17  ;;  %v907_v12 = vadd.f32 %v906_v13, %v816_v41  ;;  %v928_v25 = vadd.f32 %v927_v54, %v817_v42  ;;  %v760_v48 = vpop.permute.xlu0 %759 }
  0xf2   : > { %v690_v55 = vmax.f32 %v626_v62, 0.0  ;;  %v691_v0 = vmax.f32 %v627_v30, 0.0  ;;  %v692_v49 = vmax.f32 %v628_v56, 0.0  ;;  %v693_v7 = vmax.f32 %v629_v57, 0.0  ;;  %v568_v26 = vpop.permute.xlu1 %567  ;;  %v2019_v56 = vld [vmem:[#allocation40_spill] sm:$0xff] }
  0xf3   : > { %v630_v40 = vadd.f32 %v568_v26, %v1659_v29  ;;  %v631_v59 = vadd.f32 %v568_v26, %v1662_v37  ;;  %v632_v60 = vadd.f32 %v568_v26, %v1665_v34  ;;  %v633_v61 = vadd.f32 %v568_v26, %v1668_v23 }
  0xf4   : > { %v818_v45 = vmul.f32 %v756_v15, %v690_v55  ;;  %v819_v8 = vmul.f32 %v756_v15, %v691_v0  ;;  %v820_v2 = vmul.f32 %v756_v15, %v692_v49  ;;  %v821_v1 = vmul.f32 %v756_v15, %v693_v7  ;;  %v2018_v15 = vld [vmem:[#allocation39_spill] sm:$0xff] }
  0xf5   : > { %v694_v18 = vmax.f32 %v630_v40, 0.0  ;;  %v695_v35 = vmax.f32 %v631_v59, 0.0  ;;  %v696_v33 = vmax.f32 %v632_v60, 0.0  ;;  %v697_v4 = vmax.f32 %v633_v61, 0.0  ;;  %v764_v27 = vpop.permute.xlu0 %763 }
  0xf6   : > { %v866_v31 = vadd.f32 %v865_v46, %v818_v45  ;;  %v887_v20 = vadd.f32 %v886_v47, %v819_v8  ;;  %v908_v24 = vadd.f32 %v907_v12, %v820_v2  ;;  %v929_v43 = vadd.f32 %v928_v25, %v821_v1  ;;  %v572_v29 = vpop.permute.xlu1 %571  ;;  %v2020_v46 = vld [vmem:[#allocation41_spill] sm:$0xff]  ;;  %v2021_v47 = vld [vmem:[#allocation42_spill] sm:$0xff] }
  0xf7   : > { %v822_v13 = vmul.f32 %v760_v48, %v694_v18  ;;  %v823_v37 = vmul.f32 %v760_v48, %v695_v35  ;;  %v824_v54 = vmul.f32 %v760_v48, %v696_v33  ;;  %v825_v34 = vmul.f32 %v760_v48, %v697_v4  ;;  %v2022_v25 = vld [vmem:[#allocation10_spill] sm:$0xff] }
  0xf8   : > { %v634_v23 = vadd.f32 %v572_v29, %v1671_v38  ;;  %v635_v19 = vadd.f32 %v572_v29, %v2016_v14  ;;  %v636_v5 = vadd.f32 %v572_v29, %v2017_v36  ;;  %v637_v6 = vadd.f32 %v572_v29, %v2018_v15 }
  0xf9   : > { %v867_v39 = vadd.f32 %v866_v31, %v822_v13  ;;  %v888_v51 = vadd.f32 %v887_v20, %v823_v37  ;;  %v909_v53 = vadd.f32 %v908_v24, %v824_v54  ;;  %v930_v9 = vadd.f32 %v929_v43, %v825_v34  ;;  %v768_v50 = vpop.permute.xlu0 %767  ;;  %v2023_v20 = vld [vmem:[#allocation6_spill] sm:$0xff]  ;;  %v2024_v43 = vld [vmem:[#allocation7_spill] sm:$0xff]  ;;  %v2025_v13 = vld [vmem:[#allocation8_spill] sm:$0xff] }
  0xfa   : > { %v698_v17 = vmax.f32 %v634_v23, 0.0  ;;  %v699_v41 = vmax.f32 %v635_v19, 0.0  ;;  %v700_v42 = vmax.f32 %v636_v5, 0.0  ;;  %v701_v62 = vmax.f32 %v637_v6, 0.0  ;;  %v576_v30 = vpop.permute.xlu1 %575  ;;  %v2026_v37 = vld [vmem:[#allocation9_spill] sm:$0xff] }
  0xfb   : > { %v638_v57 = vadd.f32 %v576_v30, %v2019_v56  ;;  %v639_v38 = vadd.f32 %v576_v30, %v2020_v46  ;;  %v640_v12 = vadd.f32 %v576_v30, %v2021_v47  ;;  %v641_v48 = vadd.f32 %v576_v30, %v2022_v25 }
  0xfc   : > { %v826_v55 = vmul.f32 %v764_v27, %v698_v17  ;;  %v827_v0 = vmul.f32 %v764_v27, %v699_v41  ;;  %v828_v49 = vmul.f32 %v764_v27, %v700_v42  ;;  %v829_v7 = vmul.f32 %v764_v27, %v701_v62  ;;  %v2027_v17 = vld [vmem:[#allocation15_spill] sm:$0xff] }
  0xfd   : > { %v702_v26 = vmax.f32 %v638_v57, 0.0  ;;  %v703_v40 = vmax.f32 %v639_v38, 0.0  ;;  %v704_v59 = vmax.f32 %v640_v12, 0.0  ;;  %v705_v60 = vmax.f32 %v641_v48, 0.0  ;;  %v772_v61 = vpop.permute.xlu0 %771 }
  0xfe   : > { %v868_v45 = vadd.f32 %v867_v39, %v826_v55  ;;  %v889_v8 = vadd.f32 %v888_v51, %v827_v0  ;;  %v910_v2 = vadd.f32 %v909_v53, %v828_v49  ;;  %v931_v1 = vadd.f32 %v930_v9, %v829_v7  ;;  %v580_v18 = vpop.permute.xlu1 %579 }
  0xff   : > { %v830_v35 = vmul.f32 %v768_v50, %v702_v26  ;;  %v831_v33 = vmul.f32 %v768_v50, %v703_v40  ;;  %v832_v4 = vmul.f32 %v768_v50, %v704_v59  ;;  %v833_v31 = vmul.f32 %v768_v50, %v705_v60 }
 0x100   : > { %v642_v24 = vadd.f32 %v580_v18, %v2023_v20  ;;  %v643_v29 = vadd.f32 %v580_v18, %v2024_v43  ;;  %v644_v27 = vadd.f32 %v580_v18, %v2025_v13  ;;  %v645_v54 = vadd.f32 %v580_v18, %v2026_v37  ;;  %v2028_v20 = vld [vmem:[#allocation16_spill] sm:$0xff] }
 0x101   : > { %v869_v34 = vadd.f32 %v868_v45, %v830_v35  ;;  %v890_v23 = vadd.f32 %v889_v8, %v831_v33  ;;  %v911_v14 = vadd.f32 %v910_v2, %v832_v4  ;;  %v932_v19 = vadd.f32 %v931_v1, %v833_v31  ;;  %v776_v36 = vpop.permute.xlu0 %775 }
 0x102   : > { %v706_v5 = vmax.f32 %v642_v24, 0.0  ;;  %v707_v15 = vmax.f32 %v643_v29, 0.0  ;;  %v708_v6 = vmax.f32 %v644_v27, 0.0  ;;  %v709_v39 = vmax.f32 %v645_v54, 0.0  ;;  %v584_v51 = vpop.permute.xlu1 %583 }
 0x103   : > { %v646_v53 = vadd.f32 %v584_v51, %v1723_v3  ;;  %v647_v9 = vadd.f32 %v584_v51, %v1726_v11  ;;  %v648_v50 = vadd.f32 %v584_v51, %v1729_v10  ;;  %v649_v41 = vadd.f32 %v584_v51, %v2027_v17  ;;  %v2032_v17 = vld [vmem:[#allocation12_spill] sm:$0xff] }
 0x104   : > { %v834_v42 = vmul.f32 %v772_v61, %v706_v5  ;;  %v835_v62 = vmul.f32 %v772_v61, %v707_v15  ;;  %v836_v30 = vmul.f32 %v772_v61, %v708_v6  ;;  %v837_v56 = vmul.f32 %v772_v61, %v709_v39 }
 0x105   : > { %v710_v57 = vmax.f32 %v646_v53, 0.0  ;;  %v711_v46 = vmax.f32 %v647_v9, 0.0  ;;  %v712_v38 = vmax.f32 %v648_v50, 0.0  ;;  %v713_v47 = vmax.f32 %v649_v41, 0.0  ;;  %v780_v10 = vpop.permute.xlu0 %779  ;;  %v2031_v9 = vld [vmem:[#allocation11_spill] sm:$0xff] }
 0x106   : > { %v870_v12 = vadd.f32 %v869_v34, %v834_v42  ;;  %v891_v25 = vadd.f32 %v890_v23, %v835_v62  ;;  %v912_v48 = vadd.f32 %v911_v14, %v836_v30  ;;  %v933_v55 = vadd.f32 %v932_v19, %v837_v56  ;;  %v588_v0 = vpop.permute.xlu1 %587  ;;  %v2033_v42 = vld [vmem:[#allocation13_spill] sm:$0xff]  ;;  %v2034_v30 = vld [vmem:[#allocation14_spill] sm:$0xff] }
 0x107   : > { %v838_v3 = vmul.f32 %v776_v36, %v710_v57  ;;  %v839_v49 = vmul.f32 %v776_v36, %v711_v46  ;;  %v840_v11 = vmul.f32 %v776_v36, %v712_v38  ;;  %v841_v7 = vmul.f32 %v776_v36, %v713_v47 }
 0x108   : > { %v650_v26 = vadd.f32 %v588_v0, %v1735_v16  ;;  %v651_v40 = vadd.f32 %v588_v0, %v1738_v44  ;;  %v652_v59 = vadd.f32 %v588_v0, %v1741_v28  ;;  %v653_v60 = vadd.f32 %v588_v0, %v1744_v32  ;;  %v2029_v16 = vld [vmem:[#allocation17_spill] sm:$0xff]  ;;  %v2030_v44 = vld [vmem:[#allocation18_spill] sm:$0xff] }
 0x109   : > { %v871_v61 = vadd.f32 %v870_v12, %v838_v3  ;;  %v892_v45 = vadd.f32 %v891_v25, %v839_v49  ;;  %v913_v8 = vadd.f32 %v912_v48, %v840_v11  ;;  %v934_v2 = vadd.f32 %v933_v55, %v841_v7  ;;  %v784_v37 = vpop.permute.xlu0 %783  ;;  %v2035_v49 = vld [vmem:[#allocation27_spill] sm:$0xff] }
 0x10a   : > { %v714_v1 = vmax.f32 %v650_v26, 0.0  ;;  %v715_v18 = vmax.f32 %v651_v40, 0.0  ;;  %v716_v35 = vmax.f32 %v652_v59, 0.0  ;;  %v717_v33 = vmax.f32 %v653_v60, 0.0  ;;  %v592_v4 = vpop.permute.xlu1 %591  ;;  %v2036_v11 = vld [vmem:[#allocation23_spill] sm:$0xff]  ;;  %v2038_v26 = vld [vmem:[#allocation24_spill] sm:$0xff] }
 0x10b   : > { %v654_v31 = vadd.f32 %v592_v4, %v1747_v63  ;;  %v655_v24 = vadd.f32 %v592_v4, %v2028_v20  ;;  %v656_v43 = vadd.f32 %v592_v4, %v2029_v16  ;;  %v657_v29 = vadd.f32 %v592_v4, %v2030_v44  ;;  %v2039_v59 = vld [vmem:[#allocation29_spill] sm:$0xff] }
 0x10c   : > { %v842_v28 = vmul.f32 %v780_v10, %v714_v1  ;;  %v843_v13 = vmul.f32 %v780_v10, %v715_v18  ;;  %v844_v32 = vmul.f32 %v780_v10, %v716_v35  ;;  %v845_v27 = vmul.f32 %v780_v10, %v717_v33  ;;  %v2037_v10 = vld [vmem:[#allocation28_spill] sm:$0xff]  ;;  %v2040_v60 = vld [vmem:[#allocation25_spill] sm:$0xff] }
 0x10d   : > { %v718_v54 = vmax.f32 %v654_v31, 0.0  ;;  %v719_v34 = vmax.f32 %v655_v24, 0.0  ;;  %v720_v23 = vmax.f32 %v656_v43, 0.0  ;;  %v721_v14 = vmax.f32 %v657_v29, 0.0  ;;  %v788_v3 = vpop.permute.xlu0 %787 }
 0x10e   : > { %v872_v19 = vadd.f32 %v871_v61, %v842_v28  ;;  %v893_v36 = vadd.f32 %v892_v45, %v843_v13  ;;  %v914_v5 = vadd.f32 %v913_v8, %v844_v32  ;;  %v935_v15 = vadd.f32 %v934_v2, %v845_v27  ;;  %v596_v63 = vpop.permute.xlu1 %595  ;;  %v2041_v45 = vld [vmem:[#allocation30_spill] sm:$0xff] }
 0x10f   : > { %v846_v6 = vmul.f32 %v784_v37, %v718_v54  ;;  %v847_v39 = vmul.f32 %v784_v37, %v719_v34  ;;  %v848_v51 = vmul.f32 %v784_v37, %v720_v23  ;;  %v849_v53 = vmul.f32 %v784_v37, %v721_v14  ;;  %v2042_v8 = vld [vmem:[#allocation26_spill] sm:$0xff] }
 0x110   : > { %v658_v50 = vadd.f32 %v596_v63, %v2031_v9  ;;  %v659_v41 = vadd.f32 %v596_v63, %v2032_v17  ;;  %v660_v62 = vadd.f32 %v596_v63, %v2033_v42  ;;  %v661_v56 = vadd.f32 %v596_v63, %v2034_v30 }
 0x111   : > { %v873_v57 = vadd.f32 %v872_v19, %v846_v6  ;;  %v894_v46 = vadd.f32 %v893_v36, %v847_v39  ;;  %v915_v38 = vadd.f32 %v914_v5, %v848_v51  ;;  %v936_v47 = vadd.f32 %v935_v15, %v849_v53  ;;  %v796_v5 = vpop.permute.xlu0 %795 }
 0x112   : > { %v722_v12 = vmax.f32 %v658_v50, 0.0  ;;  %v723_v25 = vmax.f32 %v659_v41, 0.0  ;;  %v724_v48 = vmax.f32 %v660_v62, 0.0  ;;  %v725_v55 = vmax.f32 %v661_v56, 0.0  ;;  %v600_v0 = vpop.permute.xlu1 %599 }
 0x113   : > { %v538_v7 = vadd.f32 %v2036_v11, %v2035_v49  ;;  %v539_v40 = vadd.f32 %v2038_v26, %v2037_v10  ;;  %v540_v61 = vadd.f32 %v2040_v60, %v2039_v59  ;;  %v541_v2 = vadd.f32 %v2042_v8, %v2041_v45 }
 0x114   : > { %v850_v1 = vmul.f32 %v788_v3, %v722_v12  ;;  %v851_v18 = vmul.f32 %v788_v3, %v723_v25  ;;  %v852_v35 = vmul.f32 %v788_v3, %v724_v48  ;;  %v853_v33 = vmul.f32 %v788_v3, %v725_v55 }
 0x115   : > { %v662_v4 = vadd.f32 %v600_v0, %v1816_v22  ;;  %v663_v31 = vadd.f32 %v600_v0, %v1820_v52  ;;  %v664_v20 = vadd.f32 %v600_v0, %v1824_v58  ;;  %v665_v24 = vadd.f32 %v600_v0, %v1828_v21 }
 0x116   : > { %v604_v16 = vpop.permute.xlu1 %603  ;;  %v874_v43 = vadd.f32 %v873_v57, %v850_v1  ;;  %v895_v44 = vadd.f32 %v894_v46, %v851_v18  ;;  %v916_v29 = vadd.f32 %v915_v38, %v852_v35  ;;  %v937_v28 = vadd.f32 %v936_v47, %v853_v33  ;;  %v2043_v35 = vld [vmem:[#allocation5_spill] sm:$0xff] }
 0x117   : > { %v666_v13 = vadd.f32 %v604_v16, %v538_v7  ;;  %v667_v32 = vadd.f32 %v604_v16, %v539_v40  ;;  %v668_v27 = vadd.f32 %v604_v16, %v540_v61  ;;  %v669_v37 = vadd.f32 %v604_v16, %v541_v2 }
 0x118   : > { %v726_v22 = vmax.f32 %v662_v4, 0.0  ;;  %v727_v19 = vmax.f32 %v663_v31, 0.0  ;;  %v728_v52 = vmax.f32 %v664_v20, 0.0  ;;  %v729_v36 = vmax.f32 %v665_v24, 0.0 }
 0x119   : > { %v730_v54 = vmax.f32 %v666_v13, 0.0  ;;  %v731_v34 = vmax.f32 %v667_v32, 0.0  ;;  %v732_v23 = vmax.f32 %v668_v27, 0.0  ;;  %v733_v14 = vmax.f32 %v669_v37, 0.0 }
 0x11a   : > { %v1190_v25 = vmov 1966171168   ;;  %v2044_v13 = vlaneseq }
 0x11b   : > { %v792_v58 = vpop.permute.xlu1 %791  ;;  %v858_v39 = vmul.f32 %v796_v5, %v730_v54  ;;  %v859_v51 = vmul.f32 %v796_v5, %v731_v34  ;;  %v860_v53 = vmul.f32 %v796_v5, %v732_v23  ;;  %v861_v9 = vmul.f32 %v796_v5, %v733_v14 }
 0x11c   : > { %v854_v21 = vmul.f32 %v792_v58, %v726_v22  ;;  %v855_v15 = vmul.f32 %v792_v58, %v727_v19  ;;  %v856_v63 = vmul.f32 %v792_v58, %v728_v52  ;;  %v857_v6 = vmul.f32 %v792_v58, %v729_v36 }
 0x11d   : > { %v953_v48 = vunpack.c.l.s4 %v1190_v25  ;;  %vm977_vm0 = vcmp.lt.s32.totalorder %v2044_v13, 512 }
 0x11e   : > { %v875_v50 = vadd.f32 %v874_v43, %v854_v21  ;;  %v896_v17 = vadd.f32 %v895_v44, %v855_v15  ;;  %v917_v41 = vadd.f32 %v916_v29, %v856_v63  ;;  %v938_v42 = vadd.f32 %v937_v28, %v857_v6 }
 0x11f   : > { %v954_v40 = vunpack.c.0.s8 %v953_v48 }
 0x120   : > { %v876_v62 = vadd.f32 %v875_v50, %v858_v39  ;;  %v897_v30 = vadd.f32 %v896_v17, %v859_v51  ;;  %v918_v56 = vadd.f32 %v917_v41, %v860_v53  ;;  %v939_v57 = vadd.f32 %v938_v42, %v861_v9 }
 0x121   : > { %v957_v33 = vsub.s32 %v954_v40, %v2043_v35 }
 0x122   : > { %v877_v46 = vrot.slane %v876_v62, 4  ;;  %v898_v38 = vrot.slane %v897_v30, 4  ;;  %v919_v47 = vrot.slane %v918_v56, 4  ;;  %v940_v12 = vrot.slane %v939_v57, 4 }
 0x124   : > { %v878_v55 = vadd.f32 %v877_v46, %v876_v62  ;;  %v899_v0 = vadd.f32 %v898_v38, %v897_v30  ;;  %v920_v3 = vadd.f32 %v919_v47, %v918_v56  ;;  %v941_v49 = vadd.f32 %v940_v12, %v939_v57 }
 0x126   : > { %v879_v11 = vrot.slane %v878_v55, 2  ;;  %v900_v7 = vrot.slane %v899_v0, 2  ;;  %v921_v10 = vrot.slane %v920_v3, 2  ;;  %v942_v26 = vrot.slane %v941_v49, 2 }
 0x128   : > { %v880_v59 = vadd.f32 %v879_v11, %v878_v55  ;;  %v901_v60 = vadd.f32 %v900_v7, %v899_v0  ;;  %v922_v61 = vadd.f32 %v921_v10, %v920_v3  ;;  %v943_v45 = vadd.f32 %v942_v26, %v941_v49 }
 0x12a   : > { %v881_v8 = vrot.slane %v880_v59, 1  ;;  %v902_v2 = vrot.slane %v901_v60, 1  ;;  %v923_v1 = vrot.slane %v922_v61, 1  ;;  %v944_v18 = vrot.slane %v943_v45, 1 }
 0x12c   : > { %v882_v4 = vadd.f32 %v881_v8, %v880_v59  ;;  %v903_v31 = vadd.f32 %v902_v2, %v901_v60  ;;  %v924_v20 = vadd.f32 %v923_v1, %v922_v61  ;;  %v945_v24 = vadd.f32 %v944_v18, %v943_v45 }
 0x12e   : > { %v950_v16 = vcombine.low %v882_v4, %v903_v31  ;;  %v951_v43 = vcombine.low %v924_v20, %v945_v24 }
 0x130   : > { %v958_v44 = vrot.slane %v950_v16, %v957_v33  ;;  %v965_v29 = vrot.slane %v951_v43, %v957_v33 }
 0x132   : > { %v966_v28 = vcombine.low %v958_v44, %v965_v29 }
 0x134   : > { %v973_v32 = vrot.slane %v966_v28, %v957_v33 }
 0x136   : > { %979 = vst.msk [vmem:[%s137_s23] sm:$0xf] %vm977_vm0, %v973_v32 }
 0x137   : > { %1135 = shalt.err (!%p1132_p3)
}
 0x138   : > { %s1136_s4 = scalar_lea.hbm %s1885_s27, 64  ;;  %s1140_s7 = scalar_lea.hbm %s1929_s2, 128 }
 0x139   : > { %p1137_p4 = scmp.ne.s32.totalorder %s1885_s27, %s1136_s4  ;;  %p1141_p9 = scmp.lt.u32.totalorder %s1885_s27, %s1929_s2 }
 0x13a   : > { %p1142_p10 = scmp.lt.u32.totalorder %s1140_s7, %s1136_s4  ;;  %p1144_p12 = scmp.lt.u32.totalorder %s1136_s4, %s1885_s27 }
 0x13b   : > { %p1138_p7 = pnand %p1137_p4, %p1245_p5 }
 0x13c   : > { %p1143_p11 = por %p1142_p10, %p1141_p9 }
 0x13d   : > { %p1139_p8 = pneg %p1138_p7 }
 0x13e   : > { %p1145_p13 = por %p1144_p12, %p1143_p11 }
 0x140   : > { %p1146_p0 = pnand %p1145_p13, %p1139_p8 }
 0x142   : > { %1149 = shalt.err (!%p1146_p0)
}
 0x143   : > { %1068 = dma.vmem_to_hbm [thread:$0]  (%p1245_p5), %s1887_s24, 64, %s1885_s27, %s981_s28  }
 0x144 PF: > { %p1074_p1 = scmp.ge.s32.totalorder %s1184_s12, 2  ;;  %s1007_s16 = sand.u32 1, %s1172_s9  }
 0x145   : > { %s1008_s17 = scalar_lea.sflag [#allocation3], %s1007_s16 }
 0x146   : > { %p1071_p2 = pnand %p1074_p1, %p1249_p6 }
 0x148   : > { %1167 = dma.done.wait (!%p1071_p2), %s1008_s17, 64  }
 0x149   : > { %1169 = vsyncadd (!%p1071_p2), %s1008_s17, 4294967232  ;;  %p12_p3 = scmp.ge.s32.totalorder %s1232_s15, 4   ;;  %s2045_s9 = smov %s1176_s10 }
 0x14a   : > { %s2046_s10 = smov %s1180_s11  ;;  %s2047_s11 = smov %s1243_s18 }
 0x14b   : > { %s2048_s12 = smov %s1232_s15  ;;  %14 = sbr.rel (!%p12_p3) target bundleno = 3 (0x3), region = 64 }
 0x152   :  { %1013 = vsyncpa [#allocation3], 1 }
 0x153   :  { %1015 = vsyncpa [#allocation3 + $0x1], 1 }

</bundles_post_ra>
